<compile_context>
chip_gen: v5e
topology: v5e:2x2
jax: 0.10.0
libtpu: 0.0.40
codegen_flags: <defaults>
</compile_context>

<pallas_src>
import math

import jax
import jax.numpy as jnp
import numpy as np
from jax.experimental import pallas as pl
from jax.experimental.pallas import tpu as pltpu


def _round_up(n, m):
    return (n + m - 1) // m * m


def _pad2(a, rows, cols):
    r, c = a.shape
    if r == rows and c == cols:
        return a
    return jnp.pad(a, ((0, rows - r), (0, cols - c)))


def _gru_cell_kernel(x_ref, h_ref, wx_ref, whrz_ref, whn_ref, out_ref):
    hp = whn_ref.shape[0]

    x = x_ref[...]                       # [TB, HP]  matmul dtype
    h = h_ref[...]                       # [TB, HP]

    # Fused x-side matmul: one MXU push covering the r/z/n input projections.
    gx = jnp.dot(x, wx_ref[...], preferred_element_type=jnp.float32)     # [TB, 3HP]
    # Fused h-side matmul for the r and z gates.
    ghrz = jnp.dot(h, whrz_ref[...], preferred_element_type=jnp.float32)  # [TB, 2HP]

    h32 = h.astype(jnp.float32)
    # Column offsets 0 / HP / 2*HP are 128-aligned -> free lane-aligned slices.
    r_t = jax.nn.sigmoid(gx[:, :hp] + ghrz[:, :hp])                  # EUP
    z_t = jax.nn.sigmoid(gx[:, hp:2 * hp] + ghrz[:, hp:])

    # Only serialized dependent matmul: (r_t * h) @ W_hn.
    rh = (r_t * h32).astype(whn_ref.dtype)
    n_t = jnp.tanh(gx[:, 2 * hp:]
                   + jnp.dot(rh, whn_ref[...], preferred_element_type=jnp.float32))

    # hy = h*z + (1-z)*n  ==  n + z*(h - n)   (one fewer VPU op / temporary)
    out_ref[...] = (n_t + z_t * (h32 - n_t)).astype(out_ref.dtype)


def _vmem_budget_bytes(hp, tb, itemsize):
    """Generation-aware scoped-VMEM request."""
    # Resident (single-buffered) fused weights: [HP,3HP]+[HP,2HP]+[HP,HP].
    weights = 6 * hp * hp * itemsize
    # Double-buffered activation tiles (x, h in; out) + f32 in-kernel temps.
    acts = 6 * tb * hp * itemsize + 10 * tb * hp * 4
    approx = int(1.3 * (weights + acts))          # headroom for compiler temps

    try:
        cap = int(getattr(pltpu.get_tpu_info(), "vmem_capacity_bytes",
                          64 * 1024 * 1024))
    except Exception:                             # be robust off-TPU / API drift
        cap = 64 * 1024 * 1024
    ceiling = int(0.85 * cap)                     # never ask for all of VMEM
    return max(min(max(32 * 1024 * 1024, approx), ceiling), 16 * 1024 * 1024)


def permuted_gru_cell(x, lower, weights, hidden=None, matmul_dtype=None):
    """Pallas implementation of PermutedGruCell.forward.

    x      : [B, H]
    lower  : [H, H] mask
    weights: dict with keys W_ir, W_hr, W_iz, W_hz, W_in, W_hn, each [H, H]
    hidden : optional [B, H]; zeros if None (as in the PyTorch module)
    matmul_dtype : optional dtype (e.g. jnp.bfloat16) for the MXU operands;
                   accumulation and gate math stay f32. None = keep dtypes.
    """
    b, h = x.shape
    out_dtype = x.dtype
    if hidden is None:
        hidden = jnp.zeros((b, h), dtype=x.dtype)

    w_dtype = weights["W_ir"].dtype
    mm_x_dtype = matmul_dtype if matmul_dtype is not None else x.dtype
    mm_w_dtype = matmul_dtype if matmul_dtype is not None else w_dtype

    hp = _round_up(h, 128)                  # lane-dense hidden width
    tb = min(_round_up(b, 8), 256)          # batch tile (sublane multiple)
    bp = _round_up(b, tb)

    # Wrapper-side layout plumbing: pre-mask ONCE, pad, concatenate per gate.
    low = lower.astype(w_dtype)
    xp = _pad2(x, bp, hp).astype(mm_x_dtype)
    hid = _pad2(hidden, bp, hp).astype(mm_x_dtype)
    wx = jnp.concatenate(
        [_pad2(weights["W_ir"] * low, hp, hp),
         _pad2(weights["W_iz"] * low, hp, hp),
         _pad2(weights["W_in"] * low, hp, hp)], axis=1).astype(mm_w_dtype)   # [HP,3HP]
    whrz = jnp.concatenate(
        [_pad2(weights["W_hr"] * low, hp, hp),
         _pad2(weights["W_hz"] * low, hp, hp)], axis=1).astype(mm_w_dtype)   # [HP,2HP]
    whn = _pad2(weights["W_hn"] * low, hp, hp).astype(mm_w_dtype)            # [HP,HP]

    vmem_limit = _vmem_budget_bytes(hp, tb, jnp.dtype(mm_w_dtype).itemsize)

    grid = (bp // tb,)
    out = pl.pallas_call(
        _gru_cell_kernel,
        out_shape=jax.ShapeDtypeStruct((bp, hp), out_dtype),
        grid_spec=pltpu.PrefetchScalarGridSpec(
            num_scalar_prefetch=0,
            grid=grid,
            in_specs=[
                pl.BlockSpec((tb, hp), lambda i: (i, 0)),            # x tile
                pl.BlockSpec((tb, hp), lambda i: (i, 0)),            # hidden tile
                # Grid-invariant weight blocks: single-buffered, stay resident.
                pl.BlockSpec((hp, 3 * hp), lambda i: (0, 0),
                             pipeline_mode=pl.Buffered(1)),          # [W_ir|W_iz|W_in]
                pl.BlockSpec((hp, 2 * hp), lambda i: (0, 0),
                             pipeline_mode=pl.Buffered(1)),          # [W_hr|W_hz]
                pl.BlockSpec((hp, hp), lambda i: (0, 0),
                             pipeline_mode=pl.Buffered(1)),          # W_hn
            ],
            out_specs=pl.BlockSpec((tb, hp), lambda i: (i, 0)),
        ),
        compiler_params=pltpu.CompilerParams(
            dimension_semantics=("parallel",),
            vmem_limit_bytes=vmem_limit,
        ),
    )(xp, hid, wx, whrz, whn)

    return out[:b, :h]


def _reference(x, lower, weights, hidden=None):
    """Pure-JAX mirror of the PyTorch forward for a correctness check."""
    b, h = x.shape
    if hidden is None:
        hidden = jnp.zeros((b, h), dtype=x.dtype)
    W_ir = weights["W_ir"] * lower
    W_hr = weights["W_hr"] * lower
    W_iz = weights["W_iz"] * lower
    W_hz = weights["W_hz"] * lower
    W_in = weights["W_in"] * lower
    W_hn = weights["W_hn"] * lower
    r_t = jax.nn.sigmoid(x @ W_ir + hidden @ W_hr)
    z_t = jax.nn.sigmoid(x @ W_iz + hidden @ W_hz)
    n_t = jnp.tanh(x @ W_in + (r_t * hidden) @ W_hn)
    return hidden * z_t + (1.0 - z_t) * n_t


def _kaiming_uniform(key, shape, a=math.sqrt(5)):
    # Mirrors nn.init.kaiming_uniform_(w, a=sqrt(5)) for a 2-D weight
    # (fan_in = shape[1]); deterministic synthetic init.
    fan_in = shape[1]
    gain = math.sqrt(2.0 / (1.0 + a * a))
    bound = gain * math.sqrt(3.0 / fan_in)
    return jax.random.uniform(key, shape, jnp.float32, -bound, bound)


if __name__ == "__main__":
    B, H = 8, 32  # batch, hidden_size

    key = jax.random.PRNGKey(0)
    keys = jax.random.split(key, 8)

    names = ["W_ir", "W_hr", "W_iz", "W_hz", "W_in", "W_hn"]
    weights = {n: _kaiming_uniform(k, (H, H)) for n, k in zip(names, keys[:6])}

    x = jax.random.normal(keys[6], (B, H), jnp.float32)
    hidden = jax.random.normal(keys[7], (B, H), jnp.float32)
    # "lower" mask: lower-triangular permutation mask (any [H, H] mask works).
    lower = jnp.tril(jnp.ones((H, H), jnp.float32))

    out = jax.block_until_ready(permuted_gru_cell(x, lower, weights, hidden))
    ref = _reference(x, lower, weights, hidden)
    np.testing.assert_allclose(np.asarray(out), np.asarray(ref),
                               rtol=1e-5, atol=1e-5)

    # Also exercise the hidden=None (zero initial state) path.
    out0 = jax.block_until_ready(permuted_gru_cell(x, lower, weights, None))
    ref0 = _reference(x, lower, weights, None)
    np.testing.assert_allclose(np.asarray(out0), np.asarray(ref0),
                               rtol=1e-5, atol=1e-5)

    print("KERNEL_OK")
</pallas_src>

<mosaic_0001>
module attributes {stable_mosaic.version = 11 : i64} {
  func.func @_gru_cell_kernel(%arg0: i32, %arg1: memref<8x128xf32, #tpu.memory_space<vmem>>, %arg2: memref<8x128xf32, #tpu.memory_space<vmem>>, %arg3: memref<128x384xf32, #tpu.memory_space<vmem>>, %arg4: memref<128x256xf32, #tpu.memory_space<vmem>>, %arg5: memref<128x128xf32, #tpu.memory_space<vmem>>, %arg6: memref<8x128xf32, #tpu.memory_space<vmem>>) attributes {dimension_semantics = [#tpu.dimension_semantics<parallel>], iteration_bounds = array<i64: 1>, scalar_prefetch = 0 : i64, scratch_operands = 0 : i64, tpu.core_type = #tpu.core_type<tc>, window_params = [{transform_indices = @transform_0, window_bounds = array<i64: 8, 128>}, {transform_indices = @transform_1, window_bounds = array<i64: 8, 128>}, {pipeline_mode = #tpu.pipeline_mode<synchronous>, transform_indices = @transform_2, window_bounds = array<i64: 128, 384>}, {pipeline_mode = #tpu.pipeline_mode<synchronous>, transform_indices = @transform_3, window_bounds = array<i64: 128, 256>}, {pipeline_mode = #tpu.pipeline_mode<synchronous>, transform_indices = @transform_4, window_bounds = array<i64: 128, 128>}, {transform_indices = @transform_5, window_bounds = array<i64: 8, 128>}]} {
    %c0 = arith.constant 0 : index
    %c0_0 = arith.constant 0 : index
    %0 = vector.load %arg1[%c0, %c0_0] : memref<8x128xf32, #tpu.memory_space<vmem>>, vector<8x128xf32>
    %c0_1 = arith.constant 0 : index
    %c0_2 = arith.constant 0 : index
    %1 = vector.load %arg2[%c0_1, %c0_2] : memref<8x128xf32, #tpu.memory_space<vmem>>, vector<8x128xf32>
    %c0_3 = arith.constant 0 : index
    %c0_4 = arith.constant 0 : index
    %2 = vector.load %arg3[%c0_3, %c0_4] : memref<128x384xf32, #tpu.memory_space<vmem>>, vector<128x384xf32>
    %cst = arith.constant dense<0.000000e+00> : vector<8x384xf32>
    %3 = tpu.matmul %0, %2, %cst {dimension_numbers = #tpu.dot_dimension_numbers<[1], [0], [0], [1], [0, 0, 1, 1], [], []>} : vector<8x128xf32>, vector<128x384xf32>, vector<8x384xf32> -> vector<8x384xf32>
    %c0_5 = arith.constant 0 : index
    %c0_6 = arith.constant 0 : index
    %4 = vector.load %arg4[%c0_5, %c0_6] : memref<128x256xf32, #tpu.memory_space<vmem>>, vector<128x256xf32>
    %cst_7 = arith.constant dense<0.000000e+00> : vector<8x256xf32>
    %5 = tpu.matmul %1, %4, %cst_7 {dimension_numbers = #tpu.dot_dimension_numbers<[1], [0], [0], [1], [0, 0, 1, 1], [], []>} : vector<8x128xf32>, vector<128x256xf32>, vector<8x256xf32> -> vector<8x256xf32>
    %6 = vector.extract_strided_slice %3 {offsets = [0, 0], sizes = [8, 128], strides = [1, 1]} : vector<8x384xf32> to vector<8x128xf32>
    %7 = vector.extract_strided_slice %5 {offsets = [0, 0], sizes = [8, 128], strides = [1, 1]} : vector<8x256xf32> to vector<8x128xf32>
    %8 = arith.addf %6, %7 : vector<8x128xf32>
    %9 = arith.negf %8 : vector<8x128xf32>
    %10 = math.exp %9 : vector<8x128xf32>
    %cst_8 = arith.constant 1.000000e+00 : f32
    %11 = vector.broadcast %cst_8 : f32 to vector<8x128xf32>
    %12 = arith.addf %11, %10 : vector<8x128xf32>
    %13 = arith.divf %11, %12 : vector<8x128xf32>
    %14 = vector.extract_strided_slice %3 {offsets = [0, 128], sizes = [8, 128], strides = [1, 1]} : vector<8x384xf32> to vector<8x128xf32>
    %15 = vector.extract_strided_slice %5 {offsets = [0, 128], sizes = [8, 128], strides = [1, 1]} : vector<8x256xf32> to vector<8x128xf32>
    %16 = arith.addf %14, %15 : vector<8x128xf32>
    %17 = arith.negf %16 : vector<8x128xf32>
    %18 = math.exp %17 : vector<8x128xf32>
    %cst_9 = arith.constant 1.000000e+00 : f32
    %19 = vector.broadcast %cst_9 : f32 to vector<8x128xf32>
    %20 = arith.addf %19, %18 : vector<8x128xf32>
    %21 = arith.divf %19, %20 : vector<8x128xf32>
    %22 = arith.mulf %13, %1 : vector<8x128xf32>
    %23 = vector.extract_strided_slice %3 {offsets = [0, 256], sizes = [8, 128], strides = [1, 1]} : vector<8x384xf32> to vector<8x128xf32>
    %c0_10 = arith.constant 0 : index
    %c0_11 = arith.constant 0 : index
    %24 = vector.load %arg5[%c0_10, %c0_11] : memref<128x128xf32, #tpu.memory_space<vmem>>, vector<128x128xf32>
    %cst_12 = arith.constant dense<0.000000e+00> : vector<8x128xf32>
    %25 = tpu.matmul %22, %24, %cst_12 {dimension_numbers = #tpu.dot_dimension_numbers<[1], [0], [0], [1], [0, 0, 1, 1], [], []>} : vector<8x128xf32>, vector<128x128xf32>, vector<8x128xf32> -> vector<8x128xf32>
    %26 = arith.addf %23, %25 : vector<8x128xf32>
    %27 = math.tanh %26 : vector<8x128xf32>
    %28 = arith.subf %1, %27 : vector<8x128xf32>
    %29 = arith.mulf %21, %28 : vector<8x128xf32>
    %30 = arith.addf %27, %29 : vector<8x128xf32>
    %c0_13 = arith.constant 0 : index
    %c0_14 = arith.constant 0 : index
    %31 = vector.load %arg6[%c0_13, %c0_14] : memref<8x128xf32, #tpu.memory_space<vmem>>, vector<8x128xf32>
    tpu.vector_store %arg6[%c0_13, %c0_14], %30 {strides = array<i32>} : memref<8x128xf32, #tpu.memory_space<vmem>>, vector<8x128xf32>,
    return
  }
  func.func @transform_0(%arg0: i32) -> (i32, i32) {
    %c0_i32 = arith.constant 0 : i32
    %c0_i32_0 = arith.constant 0 : i32
    return %arg0, %c0_i32 : i32, i32
  }
  func.func @transform_1(%arg0: i32) -> (i32, i32) {
    %c0_i32 = arith.constant 0 : i32
    %c0_i32_0 = arith.constant 0 : i32
    return %arg0, %c0_i32 : i32, i32
  }
  func.func @transform_2(%arg0: i32) -> (i32, i32) {
    %c0_i32 = arith.constant 0 : i32
    %c0_i32_0 = arith.constant 0 : i32
    %c0_i32_1 = arith.constant 0 : i32
    return %c0_i32, %c0_i32_0 : i32, i32
  }
  func.func @transform_3(%arg0: i32) -> (i32, i32) {
    %c0_i32 = arith.constant 0 : i32
    %c0_i32_0 = arith.constant 0 : i32
    %c0_i32_1 = arith.constant 0 : i32
    return %c0_i32, %c0_i32_0 : i32, i32
  }
  func.func @transform_4(%arg0: i32) -> (i32, i32) {
    %c0_i32 = arith.constant 0 : i32
    %c0_i32_0 = arith.constant 0 : i32
    %c0_i32_1 = arith.constant 0 : i32
    return %c0_i32, %c0_i32_0 : i32, i32
  }
  func.func @transform_5(%arg0: i32) -> (i32, i32) {
    %c0_i32 = arith.constant 0 : i32
    %c0_i32_0 = arith.constant 0 : i32
    return %arg0, %c0_i32 : i32, i32
  }
}

</mosaic_0001>

<bundles_post_ra>
// kernel: tpu_custom_call.1
= control target key start
LH: loop header
LB: loop body
LE: loop exit
PB: predicated region body
PF: predicated region fallthrough
CT: control target
= control target key end

     0   :  { %10 = vsyncpa [#allocation3], 0  ;;  %s626_s0 = inlined_call_operand.hbm [shape: f32[8,128], index: 0, kind: input, shape index: {}]   ;;  %s627_s1 = inlined_call_operand.hbm [shape: f32[8,128], index: 1, kind: input, shape index: {}]   ;;  %s628_s2 = inlined_call_operand.hbm [shape: f32[128,384], index: 2, kind: input, shape index: {}]   ;;  %s629_s3 = inlined_call_operand.hbm [shape: f32[128,256], index: 3, kind: input, shape index: {}]   ;;  %s630_s4 = inlined_call_operand.hbm [shape: f32[128,128], index: 4, kind: input, shape index: {}]   ;;  %s631_s5 = inlined_call_operand.hbm [shape: f32[8,128], index: 5, kind: output, shape index: {}]  }
   0x1   :  { %11 = vsyncpa [#allocation6], 0 }
   0x2   :  { %12 = vsyncpa [#allocation9], 0  ;;  %s30_s20 = sshll.u32 %s627_s1, 4  ;;  %s31_s20 = int_to_ptr.hbm [resolvable:$true] %s30_s20 }
   0x3   :  { %13 = vsyncpa [#allocation4], 0  ;;  %s555_s21 = smov [#allocation5]   ;;  %s53_s25 = sshll.u32 %s629_s3, 4  ;;  %s54_s25 = int_to_ptr.hbm [resolvable:$true] %s53_s25 }
   0x4   :  { %s32_s22 = sshll.u32 %s555_s21, 4  ;;  %s556_s26 = smov [#allocation8]   ;;  %s33_s22 = int_to_ptr.vmem [resolvable:$true] %s32_s22 }
   0x5   :  { %35 = dma.hbm_to_vmem [thread:$0]  %s31_s20, 128, %s33_s22, [#allocation6]  }
   0x6   :  { %s55_s27 = sshll.u32 %s556_s26, 4  ;;  %s557_s28 = smov 256   ;;  %s56_s27 = int_to_ptr.vmem [resolvable:$true] %s55_s27 }
   0x7   :  { %s558_s29 = smov 16   ;;  %s19_s1 = sshll.u32 %s626_s0, 4  ;;  %s20_s1 = int_to_ptr.hbm [resolvable:$true] %s19_s1 }
   0x8   :  { %61 = dma.hbm_to_vmem [thread:$0]  %s54_s25, 4096, %s56_s27, [#allocation9], %s557_s28, %s557_s28, %s558_s29  }
   0x9   :  { %s559_s7 = smov [#allocation2]   ;;  %s40_s3 = sshll.u32 %s628_s2, 4  ;;  %s41_s3 = int_to_ptr.hbm [resolvable:$true] %s40_s3 }
   0xa   :  { %s21_s8 = sshll.u32 %s559_s7, 4  ;;  %s560_s11 = smov [#allocation7]   ;;  %s22_s8 = int_to_ptr.vmem [resolvable:$true] %s21_s8 }
   0xb   :  { %24 = dma.hbm_to_vmem [thread:$0]  %s20_s1, 128, %s22_s8, [#allocation3]  }
   0xc   :  { %s42_s12 = sshll.u32 %s560_s11, 4  ;;  %s561_s13 = smov 384   ;;  %s43_s12 = int_to_ptr.vmem [resolvable:$true] %s42_s12 }
   0xd   :  { %s562_s14 = smov 24   ;;  %s66_s0 = sshll.u32 %s630_s4, 4  ;;  %s67_s0 = int_to_ptr.hbm [resolvable:$true] %s66_s0 }
   0xe   :  { %48 = dma.hbm_to_vmem [thread:$0]  %s41_s3, 6144, %s43_s12, [#allocation6], %s561_s13, %s561_s13, %s562_s14  }
   0xf   :  { %s563_s17 = smov [#allocation10]   ;;  %s564_s19 = smov 128  }
  0x10   :  { %s68_s18 = sshll.u32 %s563_s17, 4  ;;  %s565_s20 = smov 8   ;;  %s69_s18 = int_to_ptr.vmem [resolvable:$true] %s68_s18 }
  0x11   :  { %74 = dma.hbm_to_vmem [thread:$0]  %s67_s0, 2048, %s69_s18, [#allocation9], %s564_s19, %s564_s19, %s565_s20  }
  0x12   :  { %547 = dma.done.wait [#allocation3], 128  }
  0x13   :  { %548 = vsyncadd [#allocation3], 4294967168 }
  0x14   :  { %549 = dma.done.wait [#allocation6], 6272  }
  0x15   :  { %550 = vsyncadd [#allocation6], 4294961024 }
  0x16   :  { %551 = dma.done.wait [#allocation9], 6144  }
  0x17   :  { %552 = vsyncadd [#allocation9], 4294961152  ;;  %v235_v0 = vld [vmem:[#allocation8 + $0xf0] sm:$0xff]  ;;  %v233_v1 = vld [vmem:[#allocation8 + $0xe0] sm:$0xff]  ;;  %s566_s2 = smov [#allocation11]   ;;  %s367_s23 = sshll.u32 %s631_s5, 4  ;;  %s368_s23 = int_to_ptr.hbm [resolvable:$true] %s367_s23 }
  0x18   :  { %237 = vmatpush.msra.mxu3 %v235_v0  ;;  %v142_v2 = vld [vmem:[#allocation7 + $0x168] sm:$0xff]  ;;  %v139_v3 = vld [vmem:[#allocation7 + $0x150] sm:$0xff]  ;;  %v136_v5 = vld [vmem:[#allocation7 + $0x138] sm:$0xff]  ;;  %s365_s4 = sshll.u32 %s566_s2, 4  ;;  %s366_s4 = int_to_ptr.vmem [resolvable:$true] %s365_s4 }
  0x19   :  { %v231_v4 = vld [vmem:[#allocation8 + $0xd0] sm:$0xff]  ;;  %145 = vmatpush.msra.mxu0 %v142_v2  ;;  %v229_v6 = vld [vmem:[#allocation8 + $0xc0] sm:$0xff]  ;;  %v130_v9 = vld [vmem:[#allocation7 + $0x108] sm:$0xff] }
  0x1a   :  { %238 = vmatpush.msra.mxu3 %v233_v1  ;;  %v133_v7 = vld [vmem:[#allocation7 + $0x120] sm:$0xff]  ;;  %v227_v8 = vld [vmem:[#allocation8 + $0xb0] sm:$0xff]  ;;  %v124_v13 = vld [vmem:[#allocation7 + $0xd8] sm:$0xff] }
  0x1b   :  { %146 = vmatpush.msra.mxu0 %v139_v3  ;;  %v225_v10 = vld [vmem:[#allocation8 + $0xa0] sm:$0xff]  ;;  %v127_v11 = vld [vmem:[#allocation7 + $0xf0] sm:$0xff]  ;;  %v140_v16 = vld [vmem:[#allocation7 + $0x158] sm:$0xff] }
  0x1c   :  { %239 = vmatpush.msra.mxu3 %v231_v4  ;;  %v223_v12 = vld [vmem:[#allocation8 + $0x90] sm:$0xff]  ;;  %v221_v15 = vld [vmem:[#allocation8 + $0x80] sm:$0xff]  ;;  %v118_v20 = vld [vmem:[#allocation7 + $0xa8] sm:$0xff] }
  0x1d   :  { %147 = vmatpush.msra.mxu0 %v136_v5  ;;  %v143_v14 = vld [vmem:[#allocation7 + $0x170] sm:$0xff]  ;;  %v121_v17 = vld [vmem:[#allocation7 + $0xc0] sm:$0xff]  ;;  %v134_v21 = vld [vmem:[#allocation7 + $0x128] sm:$0xff] }
  0x1e   :  { %240 = vmatpush.msra.mxu3 %v229_v6  ;;  %165 = vmatpush.msra.mxu1 %v143_v14  ;;  %v137_v18 = vld [vmem:[#allocation7 + $0x140] sm:$0xff]  ;;  %v219_v19 = vld [vmem:[#allocation8 + $0x70] sm:$0xff]  ;;  %v112_v26 = vld [vmem:[#allocation7 + $0x78] sm:$0xff] }
  0x1f   :  { %148 = vmatpush.msra.mxu0 %v133_v7  ;;  %v217_v22 = vld [vmem:[#allocation8 + $0x60] sm:$0xff]  ;;  %v115_v23 = vld [vmem:[#allocation7 + $0x90] sm:$0xff]  ;;  %v128_v27 = vld [vmem:[#allocation7 + $0xf8] sm:$0xff] }
  0x20   :  { %241 = vmatpush.msra.mxu3 %v227_v8  ;;  %166 = vmatpush.msra.mxu1 %v140_v16  ;;  %v131_v24 = vld [vmem:[#allocation7 + $0x110] sm:$0xff]  ;;  %v213_v28 = vld [vmem:[#allocation8 + $0x40] sm:$0xff]  ;;  %v106_v32 = vld [vmem:[#allocation7 + $0x48] sm:$0xff] }
  0x21   :  { %149 = vmatpush.msra.mxu0 %v130_v9  ;;  %v215_v25 = vld [vmem:[#allocation8 + $0x50] sm:$0xff]  ;;  %v109_v29 = vld [vmem:[#allocation7 + $0x60] sm:$0xff]  ;;  %v122_v33 = vld [vmem:[#allocation7 + $0xc8] sm:$0xff] }
  0x22   :  { %242 = vmatpush.msra.mxu3 %v225_v10  ;;  %167 = vmatpush.msra.mxu1 %v137_v18  ;;  %v125_v30 = vld [vmem:[#allocation7 + $0xe0] sm:$0xff]  ;;  %v211_v31 = vld [vmem:[#allocation8 + $0x30] sm:$0xff]  ;;  %v144_v38 = vld [vmem:[#allocation7 + $0x178] sm:$0xff] }
  0x23   :  { %150 = vmatpush.msra.mxu0 %v127_v11  ;;  %v209_v34 = vld [vmem:[#allocation8 + $0x20] sm:$0xff]  ;;  %v103_v35 = vld [vmem:[#allocation7 + $0x30] sm:$0xff]  ;;  %v100_v39 = vld [vmem:[#allocation7 + $0x18] sm:$0xff]  ;;  %185 = vmatpush.msra.mxu2 %v144_v38 }
  0x24   :  { %243 = vmatpush.msra.mxu3 %v223_v12  ;;  %168 = vmatpush.msra.mxu1 %v134_v21  ;;  %v119_v36 = vld [vmem:[#allocation7 + $0xb0] sm:$0xff]  ;;  %v116_v40 = vld [vmem:[#allocation7 + $0x98] sm:$0xff]  ;;  %v205_v41 = vld [vmem:[#allocation8] sm:$0xff] }
  0x25   :  { %151 = vmatpush.msra.mxu0 %v124_v13  ;;  %v207_v37 = vld [vmem:[#allocation8 + $0x10] sm:$0xff]  ;;  %v141_v42 = vld [vmem:[#allocation7 + $0x160] sm:$0xff]  ;;  %v612_v43 = vld [vmem:[#allocation5] sm:$0xff] }
  0x26   :  { %244 = vmatpush.msra.mxu3 %v221_v15  ;;  %169 = vmatpush.msra.mxu1 %v131_v24  ;;  %v97_v44 = vld [vmem:[#allocation7] sm:$0xff]  ;;  %v614_v45 = vld [vmem:[#allocation2] sm:$0xff]  ;;  %v236_v47 = vld [vmem:[#allocation8 + $0xf8] sm:$0xff] }
  0x27   :  { %152 = vmatpush.msra.mxu0 %v121_v17  ;;  %186 = vmatpush.msra.mxu2 %v141_v42  ;;  %v113_v46 = vld [vmem:[#allocation7 + $0x80] sm:$0xff]  ;;  %v110_v48 = vld [vmem:[#allocation7 + $0x68] sm:$0xff]  ;;  %v107_v50 = vld [vmem:[#allocation7 + $0x50] sm:$0xff] }
  0x28   :  { %245 = vmatpush.msra.mxu3 %v219_v19  ;;  %170 = vmatpush.msra.mxu1 %v128_v27  ;;  %v234_v49 = vld [vmem:[#allocation8 + $0xe8] sm:$0xff]  ;;  %v232_v51 = vld [vmem:[#allocation8 + $0xd8] sm:$0xff]  ;;  %v101_v54 = vld [vmem:[#allocation7 + $0x20] sm:$0xff] }
  0x29   :  { %153 = vmatpush.msra.mxu0 %v118_v20  ;;  %v104_v52 = vld [vmem:[#allocation7 + $0x38] sm:$0xff]  ;;  %v230_v53 = vld [vmem:[#allocation8 + $0xc8] sm:$0xff]  ;;  %v135_v5 = vld [vmem:[#allocation7 + $0x130] sm:$0xff] }
  0x2a   :  { %246 = vmatpush.msra.mxu3 %v217_v22  ;;  %171 = vmatpush.msra.mxu1 %v125_v30  ;;  %v228_v55 = vld [vmem:[#allocation8 + $0xb8] sm:$0xff]  ;;  %v226_v56 = vld [vmem:[#allocation8 + $0xa8] sm:$0xff]  ;;  %v332_v8 = vld [vmem:[#allocation10 + $0x70] sm:$0xff] }
  0x2b   :  { %154 = vmatpush.msra.mxu0 %v115_v23  ;;  %v224_v57 = vld [vmem:[#allocation8 + $0x98] sm:$0xff]  ;;  %v222_v58 = vld [vmem:[#allocation8 + $0x88] sm:$0xff]  ;;  %v129_v9 = vld [vmem:[#allocation7 + $0x100] sm:$0xff] }
  0x2c   :  { %247 = vmatpush.msra.mxu3 %v215_v25  ;;  %172 = vmatpush.msra.mxu1 %v122_v33  ;;  %v220_v59 = vld [vmem:[#allocation8 + $0x78] sm:$0xff]  ;;  %v218_v60 = vld [vmem:[#allocation8 + $0x68] sm:$0xff]  ;;  %v330_v12 = vld [vmem:[#allocation10 + $0x60] sm:$0xff] }
  0x2d   :  { %155 = vmatpush.msra.mxu0 %v112_v26  ;;  %v216_v61 = vld [vmem:[#allocation8 + $0x58] sm:$0xff]  ;;  %v214_v62 = vld [vmem:[#allocation8 + $0x48] sm:$0xff]  ;;  %v123_v13 = vld [vmem:[#allocation7 + $0xd0] sm:$0xff] }
  0x2e   :  { %248 = vmatpush.msra.mxu3 %v213_v28  ;;  %173 = vmatpush.msra.mxu1 %v119_v36  ;;  %v212_v63 = vld [vmem:[#allocation8 + $0x38] sm:$0xff]  ;;  %v210_v0 = vld [vmem:[#allocation8 + $0x28] sm:$0xff]  ;;  %v328_v16 = vld [vmem:[#allocation10 + $0x50] sm:$0xff] }
  0x2f   :  { %156 = vmatpush.msra.mxu0 %v109_v29  ;;  %v208_v1 = vld [vmem:[#allocation8 + $0x18] sm:$0xff]  ;;  %v98_v2 = vld [vmem:[#allocation7 + $0x8] sm:$0xff]  ;;  %v117_v17 = vld [vmem:[#allocation7 + $0xa0] sm:$0xff] }
  0x30   :  { %249 = vmatpush.msra.mxu3 %v211_v31  ;;  %174 = vmatpush.msra.mxu1 %v116_v40  ;;  %v138_v3 = vld [vmem:[#allocation7 + $0x148] sm:$0xff]  ;;  %v333_v6 = vld [vmem:[#allocation10 + $0x78] sm:$0xff]  ;;  %v326_v20 = vld [vmem:[#allocation10 + $0x40] sm:$0xff] }
  0x31   :  { %157 = vmatpush.msra.mxu0 %v106_v32  ;;  %187 = vmatpush.msra.mxu2 %v138_v3  ;;  %v206_v4 = vld [vmem:[#allocation8 + $0x8] sm:$0xff]  ;;  %v132_v7 = vld [vmem:[#allocation7 + $0x118] sm:$0xff]  ;;  %v111_v21 = vld [vmem:[#allocation7 + $0x70] sm:$0xff] }
  0x32   :  { %250 = vmatpush.msra.mxu3 %v209_v34  ;;  %175 = vmatpush.msra.mxu1 %v113_v46  ;;  %v331_v10 = vld [vmem:[#allocation10 + $0x68] sm:$0xff]  ;;  %v329_v14 = vld [vmem:[#allocation10 + $0x58] sm:$0xff]  ;;  %v324_v24 = vld [vmem:[#allocation10 + $0x30] sm:$0xff] }
  0x33   :  { %158 = vmatpush.msra.mxu0 %v103_v35  ;;  %188 = vmatpush.msra.mxu2 %v135_v5  ;;  %v126_v11 = vld [vmem:[#allocation7 + $0xe8] sm:$0xff]  ;;  %v120_v15 = vld [vmem:[#allocation7 + $0xb8] sm:$0xff]  ;;  %v105_v25 = vld [vmem:[#allocation7 + $0x40] sm:$0xff] }
  0x34   :  { %251 = vmatpush.msra.mxu3 %v207_v37  ;;  %176 = vmatpush.msra.mxu1 %v110_v48  ;;  %v327_v18 = vld [vmem:[#allocation10 + $0x48] sm:$0xff]  ;;  %v325_v22 = vld [vmem:[#allocation10 + $0x38] sm:$0xff]  ;;  %v322_v28 = vld [vmem:[#allocation10 + $0x20] sm:$0xff] }
  0x35   :  { %159 = vmatpush.msra.mxu0 %v100_v39  ;;  %189 = vmatpush.msra.mxu2 %v132_v7  ;;  %v114_v19 = vld [vmem:[#allocation7 + $0x88] sm:$0xff]  ;;  %v108_v23 = vld [vmem:[#allocation7 + $0x58] sm:$0xff]  ;;  %v99_v29 = vld [vmem:[#allocation7 + $0x10] sm:$0xff] }
  0x36   :  { %252 = vmatpush.msra.mxu3 %v205_v41  ;;  %177 = vmatpush.msra.mxu1 %v107_v50  ;;  %v323_v26 = vld [vmem:[#allocation10 + $0x28] sm:$0xff]  ;;  %v321_v30 = vld [vmem:[#allocation10 + $0x18] sm:$0xff]  ;;  %v320_v31 = vld [vmem:[#allocation10 + $0x10] sm:$0xff] }
  0x37   :  { %253 = vmatmul.f32.vlgmr.msra.gmra.mxu3 %v612_v43  ;;  %160 = vmatpush.msra.mxu0 %v97_v44  ;;  %v102_v27 = vld [vmem:[#allocation7 + $0x28] sm:$0xff]  ;;  %v318_v33 = vld [vmem:[#allocation10] sm:$0xff] }
  0x38   :  { %161 = vmatmul.f32.vlgmr.msra.gmra.mxu0 %v614_v45  ;;  %178 = vmatpush.msra.mxu1 %v104_v52  ;;  %v319_v32 = vld [vmem:[#allocation10 + $0x8] sm:$0xff] }
  0x39   :  { %257 = vmatpush.msrb.mxu0 %v236_v47  ;;  %190 = vmatpush.msra.mxu2 %v129_v9 }
  0x3a   :  { %179 = vmatpush.msra.mxu1 %v101_v54 }
  0x3b   :  { %258 = vmatpush.msrb.mxu0 %v234_v49  ;;  %191 = vmatpush.msra.mxu2 %v126_v11 }
  0x3c   :  { %180 = vmatpush.msra.mxu1 %v98_v2 }
  0x3d   :  { %259 = vmatpush.msrb.mxu0 %v232_v51  ;;  %181 = vmatmul.f32.vlgmr.msra.gmra.mxu1 %v614_v45 }
  0x3e   :  { %334 = vmatpush.msrb.mxu1 %v333_v6  ;;  %192 = vmatpush.msra.mxu2 %v123_v13 }
  0x3f   :  { %260 = vmatpush.msrb.mxu0 %v230_v53 }
  0x40   :  { %335 = vmatpush.msrb.mxu1 %v332_v8  ;;  %193 = vmatpush.msra.mxu2 %v120_v15 }
  0x41   :  { %261 = vmatpush.msrb.mxu0 %v228_v55 }
  0x42   :  { %336 = vmatpush.msrb.mxu1 %v331_v10  ;;  %194 = vmatpush.msra.mxu2 %v117_v17 }
  0x43   :  { %262 = vmatpush.msrb.mxu0 %v226_v56 }
  0x44   :  { %337 = vmatpush.msrb.mxu1 %v330_v12  ;;  %195 = vmatpush.msra.mxu2 %v114_v19 }
  0x45   :  { %263 = vmatpush.msrb.mxu0 %v224_v57 }
  0x46   :  { %338 = vmatpush.msrb.mxu1 %v329_v14  ;;  %196 = vmatpush.msra.mxu2 %v111_v21 }
  0x47   :  { %264 = vmatpush.msrb.mxu0 %v222_v58 }
  0x48   :  { %339 = vmatpush.msrb.mxu1 %v328_v16  ;;  %197 = vmatpush.msra.mxu2 %v108_v23 }
  0x49   :  { %265 = vmatpush.msrb.mxu0 %v220_v59 }
  0x4a   :  { %340 = vmatpush.msrb.mxu1 %v327_v18  ;;  %198 = vmatpush.msra.mxu2 %v105_v25 }
  0x4b   :  { %266 = vmatpush.msrb.mxu0 %v218_v60 }
  0x4c   :  { %341 = vmatpush.msrb.mxu1 %v326_v20  ;;  %199 = vmatpush.msra.mxu2 %v102_v27 }
  0x4d   :  { %267 = vmatpush.msrb.mxu0 %v216_v61 }
  0x4e   :  { %342 = vmatpush.msrb.mxu1 %v325_v22  ;;  %200 = vmatpush.msra.mxu2 %v99_v29 }
  0x4f   :  { %268 = vmatpush.msrb.mxu0 %v214_v62  ;;  %201 = vmatmul.f32.vlgmr.msra.gmra.mxu2 %v614_v45 }
  0x50   :  { %343 = vmatpush.msrb.mxu1 %v324_v24 }
  0x51   :  { %269 = vmatpush.msrb.mxu0 %v212_v63 }
  0x52   :  { %344 = vmatpush.msrb.mxu1 %v323_v26 }
  0x53   :  { %270 = vmatpush.msrb.mxu0 %v210_v0 }
  0x54   :  { %345 = vmatpush.msrb.mxu1 %v322_v28 }
  0x55   :  { %271 = vmatpush.msrb.mxu0 %v208_v1 }
  0x56   :  { %346 = vmatpush.msrb.mxu1 %v321_v30 }
  0x57   :  { %272 = vmatpush.msrb.mxu0 %v206_v4 }
  0x58   :  { %273 = vmatmul.f32.vlgmr.msrb.gmra.mxu0 %v612_v43  ;;  %347 = vmatpush.msrb.mxu1 %v320_v31 }
  0x5a   :  { %348 = vmatpush.msrb.mxu1 %v319_v32 }
  0x5c   :  { %349 = vmatpush.msrb.mxu1 %v318_v33 }
  0xb5   :  { %v162_v34 = vpop.f32.mrf.mxu0 }
  0xba   :  { %v254_v35 = vpop.f32.mrf.mxu3  ;;  %v182_v52 = vpop.f32.mrf.mxu1 }
  0xbb   :  { %v277_v36 = vadd.f32 %v254_v35, %v162_v34 }
  0xbd   :  { %v379_v37 = vmul.f32 -1.442695, %v277_v36 }
  0xbf   :  { %393 = vpow2.f32 %v379_v37 }
  0xc5   :  { %v394_v38 = vpop.eup %393 }
  0xc6   :  { %v281_v39 = vadd.f32 1.0, %v394_v38 }
  0xc8   :  { %395 = vrcp.f32 %v281_v39  ;;  %v293_v44 = vand.u32 2147483648, %v281_v39  ;;  %v291_v45 = vand.u32 2147483647, %v281_v39  ;;  %vm287_vm1 = vweird.f32 %v281_v39 }
  0xca   :  { %v294_v48 = vor.u32 1.1754944e-38, %v293_v44  ;;  %vm292_vm3 = vcmp.eq.f32.partialorder %v291_v45, 8.507059e+37 }
  0xce   :  { %v396_v40 = vpop.eup %395 }
  0xcf   :  { %v283_v41 = vmul.f32 %v396_v40, %v281_v39  ;;  %vm288_vm0 = vweird.f32 %v396_v40 }
  0xd0   :  { %vm289_vm2 = vmor %vm287_vm1, %vm288_vm0 }
  0xd1   :  { %v284_v42 = vsub.f32 1.0, %v283_v41 }
  0xd2   :  { %v202_v61 = vpop.f32.mrf.mxu2 }
  0xd3   :  { %v285_v46 = vmul.f32 %v396_v40, %v284_v42 }
  0xd5   :  { %v286_v47 = vadd.f32 %v396_v40, %v285_v46  ;;  %v274_v53 = vpop.f32.mrf.mxu0 }
  0xd6   :  { %v297_v54 = vadd.f32 %v274_v53, %v182_v52 }
  0xd7   :  { %v290_v49 = vsel %vm289_vm2, %v396_v40, %v286_v47 }
  0xd8   :  { %v295_v50 = vsel %vm292_vm3, %v294_v48, %v290_v49  ;;  %v380_v55 = vmul.f32 -1.442695, %v297_v54 }
  0xd9   :  { %v317_v51 = vmul.f32 %v295_v50, %v612_v43 }
  0xda   :  { %397 = vpow2.f32 %v380_v55 }
  0xdb   :  { %350 = vmatmul.f32.vlgmr.msrb.gmra.mxu1 %v317_v51 }
  0xe0   :  { %v398_v56 = vpop.eup %397 }
  0xe1   :  { %v301_v57 = vadd.f32 1.0, %v398_v56 }
  0xe3   :  { %399 = vrcp.f32 %v301_v57  ;;  %vm307_vm4 = vweird.f32 %v301_v57  ;;  %v313_v1 = vand.u32 2147483648, %v301_v57  ;;  %v311_v3 = vand.u32 2147483647, %v301_v57 }
  0xe5   :  { %v314_v4 = vor.u32 1.1754944e-38, %v313_v1  ;;  %vm312_vm7 = vcmp.eq.f32.partialorder %v311_v3, 8.507059e+37 }
  0xe9   :  { %v400_v58 = vpop.eup %399 }
  0xea   :  { %v303_v59 = vmul.f32 %v400_v58, %v301_v57  ;;  %vm308_vm5 = vweird.f32 %v400_v58 }
  0xeb   :  { %vm309_vm6 = vmor %vm307_vm4, %vm308_vm5 }
  0xec   :  { %v304_v60 = vsub.f32 1.0, %v303_v59 }
  0xee   :  { %v305_v63 = vmul.f32 %v400_v58, %v304_v60 }
  0xf0   :  { %v306_v2 = vadd.f32 %v400_v58, %v305_v63 }
  0xf2   :  { %v310_v5 = vsel %vm309_vm6, %v400_v58, %v306_v2 }
  0xf3   :  { %v315_v8 = vsel %vm312_vm7, %v314_v4, %v310_v5 }
 0x158   :  { %v351_v62 = vpop.f32.mrf.mxu1 }
 0x159   :  { %v354_v0 = vadd.f32 %v351_v62, %v202_v61 }
 0x15b   :  { %401 = vtanh.f32 %v354_v0 }
 0x161   :  { %v402_v6 = vpop.eup %401 }
 0x162   :  { %v356_v7 = vsub.f32 %v612_v43, %v402_v6 }
 0x164   :  { %v357_v9 = vmul.f32 %v356_v7, %v315_v8 }
 0x166   :  { %v358_v10 = vadd.f32 %v402_v6, %v357_v9 }
 0x168   :  { %359 = vst [vmem:[#allocation11] sm:$0xff] %v358_v10 }
 0x169   :  { %370 = dma.vmem_to_hbm [thread:$0]  %s366_s4, 128, %s368_s23, [#allocation4]  }
 0x16a   :  { %553 = dma.done.wait [#allocation4], 128  }
 0x16b   :  { %554 = vsyncadd [#allocation4], 4294967168 }
 0x16c   :  { %375 = vsyncpa [#allocation3], 1 }
 0x16d   :  { %376 = vsyncpa [#allocation6], 1 }
 0x16e   :  { %377 = vsyncpa [#allocation9], 1 }
 0x16f   :  { %378 = vsyncpa [#allocation4], 1 }

</bundles_post_ra>
